<compile_context>
chip_gen: v7x
topology: tpu7x:2x2x1
jax: 0.10.0
libtpu: 0.0.40
codegen_flags: <defaults>
</compile_context>

<pallas_src>
import jax
import jax.numpy as jnp
from jax.experimental import pallas as pl
from jax.experimental.pallas import tpu as pltpu

NUM_CLASSES = 1
C_FEAT = 256  # backbone output channels (fixed by the head's Conv2d(256, ...))


def _head_kernel(x_ref, w1_ref, w2_ref, b2_ref, o_ref):
    # x_ref : (bn, C, tp)      native dtype (f32/bf16) -- cast to bf16 here
    # w1_ref: (C, C)           bf16, Conv2d(256,256,1) weight, (out, in) layout
    # w2_ref: (ncls_pad, C)    bf16, Conv2d(256,ncls,1) weight, rows padded to >=8
    # b2_ref: (ncls, 1)        f32, Conv2d(256,ncls,1) bias column (VMEM)
    # o_ref : (bn, ncls, tp)   f32, lane-dense output block
    bn = x_ref.shape[0]
    ncls = o_ref.shape[1]
    bias = b2_ref[...]                                   # (ncls, 1), hoisted

    for b in range(bn):                                   # static unroll, bn small
        x = x_ref[b].astype(jnp.bfloat16)                 # (C, tp) cast under MXU
        # Layer 1 on the MXU: bf16 x bf16 -> f32 accumulator, ReLU in f32.
        h = jnp.dot(w1_ref[...], x, preferred_element_type=jnp.float32)   # (C, tp)
        h = jnp.maximum(h, 0.0).astype(jnp.bfloat16)
        # Layer 2 on the MXU as well (w2 rows padded to a multiple of 8).
        y = jnp.dot(w2_ref[...], h, preferred_element_type=jnp.float32)   # (ncls_pad, tp)
        y = y[:ncls, :] + bias                                            # (ncls, tp)
        o_ref[b] = jax.nn.sigmoid(y).astype(o_ref.dtype)


def _choose_tiles(N, HW, *, max_tp=4096, target_pix=4096):
    """Pick (batch block bn, pixel tile tp, #pixel tiles) for grid (N//bn, n_pt)."""
    HWp = pl.cdiv(HW, 128) * 128
    if HWp <= max_tp:
        tp = HWp
    else:
        n_pt = pl.cdiv(HWp, max_tp)
        tp = pl.cdiv(pl.cdiv(HW, n_pt), 128) * 128        # balanced tiles
    n_pt = pl.cdiv(HW, tp)

    # Batch blocking: amortize the ~600-cycle per-step overhead on small maps,
    # but keep the total grid >= 2 steps when possible (two v7x TensorCores).
    bn = 1
    if tp < target_pix and N > 1:
        max_bn = max(1, target_pix // tp)
        if n_pt == 1:
            max_bn = min(max_bn, max(1, N // 2))
        for cand in range(min(max_bn, N), 0, -1):
            if N % cand == 0:
                bn = cand
                break

    # N == 1 with a single small tile: split into two balanced pixel tiles so
    # both v7x TensorCores get work.
    if N == 1 and n_pt == 1 and HWp >= 256:
        tp = pl.cdiv(pl.cdiv(HW, 2), 128) * 128
        n_pt = pl.cdiv(HW, tp)
    return bn, tp, n_pt


def fmnet_head(feat_nchw, w1, w2, b2, *, max_tp=4096):
    """Apply the FMNet head to a backbone feature map.

    feat_nchw: (N, 256, H, W)   any float dtype (f32/bf16), consumed as-is
    w1: (256, 256)   Conv2d(256,256,1) weight in (out, in) layout
    w2: (ncls, 256)  Conv2d(256,ncls,1) weight in (out, in) layout
    b2: (ncls,)      Conv2d(256,ncls,1) bias
    returns (N, ncls, H, W) float32 probabilities.
    """
    N, C, H, W = feat_nchw.shape
    assert C == C_FEAT
    ncls = w2.shape[0]
    HW = H * W

    bn, tp, n_pt = _choose_tiles(N, HW, max_tp=max_tp)

    # NCHW is already (N, C, pixels)-contiguous: reshape is free.  No wrapper-side
    # dtype cast, no pad pass -- the last pixel tile is a masked boundary block.
    x3 = feat_nchw.reshape(N, C, HW)

    w1b = w1.astype(jnp.bfloat16)                          # (out, in)
    ncls_pad = max(8, pl.cdiv(ncls, 8) * 8)
    w2b = jnp.zeros((ncls_pad, C), jnp.bfloat16).at[:ncls].set(w2.astype(jnp.bfloat16))
    b2f = b2.reshape(ncls, 1).astype(jnp.float32)

    grid = (N // bn, n_pt)
    out3 = pl.pallas_call(
        _head_kernel,
        out_shape=jax.ShapeDtypeStruct((N, ncls, HW), jnp.float32),
        grid_spec=pltpu.PrefetchScalarGridSpec(
            num_scalar_prefetch=0,
            grid=grid,
            in_specs=[
                pl.BlockSpec((bn, C, tp), lambda n, p: (n, 0, p)),
                pl.BlockSpec((C, C), lambda n, p: (0, 0)),          # resident weight
                pl.BlockSpec((ncls_pad, C), lambda n, p: (0, 0)),   # resident weight
                pl.BlockSpec((ncls, 1), lambda n, p: (0, 0)),       # resident bias
            ],
            out_specs=pl.BlockSpec((bn, ncls, tp), lambda n, p: (n, 0, p)),
        ),
        compiler_params=pltpu.CompilerParams(
            dimension_semantics=("parallel", "parallel"),
            vmem_limit_bytes=48 * 1024 * 1024,
        ),
    )(x3, w1b, w2b, b2f)

    return out3.reshape(N, ncls, H, W)


def init_params(key, num_classes=NUM_CLASSES):
    k1, k2, k3 = jax.random.split(key, 3)
    # Conv2d(256,256,1,bias=False): weight (out=256, in=256, 1, 1) -> (out, in)
    w1 = jax.random.normal(k1, (C_FEAT, C_FEAT), jnp.float32) / jnp.sqrt(C_FEAT)
    # Conv2d(256,num_classes,1): weight (out=ncls, in=256, 1, 1) -> (out, in)
    w2 = jax.random.normal(k2, (num_classes, C_FEAT), jnp.float32) / jnp.sqrt(C_FEAT)
    b2 = jax.random.normal(k3, (num_classes,), jnp.float32) * 0.01
    return w1, w2, b2


def reference_head(feat_nchw, w1, w2, b2):
    # Pure-JAX f32 reference of the same head.
    N, C, H, W = feat_nchw.shape
    x = feat_nchw.reshape(N, C, H * W)
    h = jnp.maximum(jnp.einsum("oc,ncp->nop", w1, x), 0.0)
    y = jnp.einsum("oc,ncp->nop", w2, h) + b2[None, :, None]
    return jax.nn.sigmoid(y).reshape(N, w2.shape[0], H, W)


if __name__ == "__main__":
    key = jax.random.PRNGKey(0)
    kx, kp = jax.random.split(key)

    # Synthetic backbone output: (batch=2, channels=256, spatial=16x16)
    feat = jax.random.normal(kx, (2, C_FEAT, 16, 16), jnp.float32)
    w1, w2, b2 = init_params(kp)

    out = jax.block_until_ready(fmnet_head(feat, w1, w2, b2))
    ref = reference_head(feat, w1, w2, b2)

    assert out.shape == (2, NUM_CLASSES, 16, 16)
    # bf16 activations/weights with f32 accumulation: loosened tolerance vs. f32 ref.
    assert jnp.allclose(out, ref, atol=2e-2, rtol=2e-2)

    print("KERNEL_OK")
</pallas_src>

<mosaic_0001>
module attributes {stable_mosaic.version = 11 : i64} {
  func.func @_head_kernel(%arg0: i32, %arg1: i32, %arg2: memref<1x256x256xf32, #tpu.memory_space<vmem>>, %arg3: memref<256x256xbf16, #tpu.memory_space<vmem>>, %arg4: memref<8x256xbf16, #tpu.memory_space<vmem>>, %arg5: memref<1x1xf32, #tpu.memory_space<vmem>>, %arg6: memref<1x1x256xf32, #tpu.memory_space<vmem>>) attributes {dimension_semantics = [#tpu.dimension_semantics<parallel>, #tpu.dimension_semantics<parallel>], iteration_bounds = array<i64: 2, 1>, scalar_prefetch = 0 : i64, scratch_operands = 0 : i64, tpu.core_type = #tpu.core_type<tc>, window_params = [{transform_indices = @transform_0, window_bounds = array<i64: 1, 256, 256>}, {pipeline_mode = #tpu.pipeline_mode<synchronous>, transform_indices = @transform_1, window_bounds = array<i64: 256, 256>}, {pipeline_mode = #tpu.pipeline_mode<synchronous>, transform_indices = @transform_2, window_bounds = array<i64: 8, 256>}, {pipeline_mode = #tpu.pipeline_mode<synchronous>, transform_indices = @transform_3, window_bounds = array<i64: 1, 1>}, {transform_indices = @transform_4, window_bounds = array<i64: 1, 1, 256>}]} {
    %c0 = arith.constant 0 : index
    %c0_0 = arith.constant 0 : index
    %0 = vector.load %arg5[%c0, %c0_0] : memref<1x1xf32, #tpu.memory_space<vmem>>, vector<1x1xf32>
    %c0_1 = arith.constant 0 : index
    %c0_2 = arith.constant 0 : index
    %c0_3 = arith.constant 0 : index
    %1 = vector.load %arg2[%c0_1, %c0_2, %c0_3] : memref<1x256x256xf32, #tpu.memory_space<vmem>>, vector<1x256x256xf32>
    %2 = vector.shape_cast %1 : vector<1x256x256xf32> to vector<256x256xf32>
    %3 = arith.truncf %2 : vector<256x256xf32> to vector<256x256xbf16>
    %c0_4 = arith.constant 0 : index
    %c0_5 = arith.constant 0 : index
    %4 = vector.load %arg3[%c0_4, %c0_5] : memref<256x256xbf16, #tpu.memory_space<vmem>>, vector<256x256xbf16>
    %cst = arith.constant dense<0.000000e+00> : vector<256x256xf32>
    %5 = tpu.matmul %4, %3, %cst {dimension_numbers = #tpu.dot_dimension_numbers<[1], [0], [0], [1], [0, 0, 1, 1], [], []>} : vector<256x256xbf16>, vector<256x256xbf16>, vector<256x256xf32> -> vector<256x256xf32>
    %cst_6 = arith.constant 0.000000e+00 : f32
    %6 = vector.broadcast %cst_6 : f32 to vector<256x256xf32>
    %7 = arith.maximumf %5, %6 : vector<256x256xf32>
    %8 = arith.truncf %7 : vector<256x256xf32> to vector<256x256xbf16>
    %c0_7 = arith.constant 0 : index
    %c0_8 = arith.constant 0 : index
    %9 = vector.load %arg4[%c0_7, %c0_8] : memref<8x256xbf16, #tpu.memory_space<vmem>>, vector<8x256xbf16>
    %cst_9 = arith.constant dense<0.000000e+00> : vector<8x256xf32>
    %10 = tpu.matmul %9, %8, %cst_9 {dimension_numbers = #tpu.dot_dimension_numbers<[1], [0], [0], [1], [0, 0, 1, 1], [], []>} : vector<8x256xbf16>, vector<256x256xbf16>, vector<8x256xf32> -> vector<8x256xf32>
    %11 = vector.extract_strided_slice %10 {offsets = [0, 0], sizes = [1, 256], strides = [1, 1]} : vector<8x256xf32> to vector<1x256xf32>
    %12 = vector.broadcast %0 : vector<1x1xf32> to vector<1x256xf32>
    %13 = arith.addf %11, %12 : vector<1x256xf32>
    %14 = arith.negf %13 : vector<1x256xf32>
    %15 = math.exp %14 : vector<1x256xf32>
    %cst_10 = arith.constant 1.000000e+00 : f32
    %16 = vector.broadcast %cst_10 : f32 to vector<1x256xf32>
    %17 = arith.addf %16, %15 : vector<1x256xf32>
    %18 = arith.divf %16, %17 : vector<1x256xf32>
    %c0_11 = arith.constant 0 : index
    %c0_12 = arith.constant 0 : index
    %c0_13 = arith.constant 0 : index
    %19 = vector.load %arg6[%c0_11, %c0_12, %c0_13] : memref<1x1x256xf32, #tpu.memory_space<vmem>>, vector<1x1x256xf32>
    %20 = vector.shape_cast %19 : vector<1x1x256xf32> to vector<1x256xf32>
    %21 = vector.shape_cast %18 : vector<1x256xf32> to vector<1x1x256xf32>
    tpu.vector_store %arg6[%c0_11, %c0_12, %c0_13], %21 {strides = array<i32>} : memref<1x1x256xf32, #tpu.memory_space<vmem>>, vector<1x1x256xf32>,
    return
  }
  func.func @transform_0(%arg0: i32, %arg1: i32) -> (i32, i32, i32) {
    %c0_i32 = arith.constant 0 : i32
    %c0_i32_0 = arith.constant 0 : i32
    return %arg0, %c0_i32, %arg1 : i32, i32, i32
  }
  func.func @transform_1(%arg0: i32, %arg1: i32) -> (i32, i32) {
    %c0_i32 = arith.constant 0 : i32
    %c0_i32_0 = arith.constant 0 : i32
    %c0_i32_1 = arith.constant 0 : i32
    return %c0_i32, %c0_i32_0 : i32, i32
  }
  func.func @transform_2(%arg0: i32, %arg1: i32) -> (i32, i32) {
    %c0_i32 = arith.constant 0 : i32
    %c0_i32_0 = arith.constant 0 : i32
    %c0_i32_1 = arith.constant 0 : i32
    return %c0_i32, %c0_i32_0 : i32, i32
  }
  func.func @transform_3(%arg0: i32, %arg1: i32) -> (i32, i32) {
    %c0_i32 = arith.constant 0 : i32
    %c0_i32_0 = arith.constant 0 : i32
    %c0_i32_1 = arith.constant 0 : i32
    return %c0_i32, %c0_i32_0 : i32, i32
  }
  func.func @transform_4(%arg0: i32, %arg1: i32) -> (i32, i32, i32) {
    %c0_i32 = arith.constant 0 : i32
    %c0_i32_0 = arith.constant 0 : i32
    return %arg0, %c0_i32, %arg1 : i32, i32, i32
  }
}

</mosaic_0001>

<bundles_post_ra>
// kernel: tpu_custom_call.1
= control target key start
LH: loop header
LB: loop body
LE: loop exit
PB: predicated region body
PF: predicated region fallthrough
CT: control target
= control target key end

     0   :  { %s1706_s0 = inlined_call_operand.hbm [shape: f32[2,256,256], index: 0, kind: input, shape index: {}]   ;;  %s1707_s1 = inlined_call_operand.hbm [shape: bf16[256,256], index: 1, kind: input, shape index: {}]   ;;  %s1708_s2 = inlined_call_operand.vmem [shape: bf16[8,256], index: 2, kind: input, shape index: {}]   ;;  %s1709_s3 = inlined_call_operand.<no memory space> [shape: f32[1,1], index: 3, kind: input, shape index: {}]   ;;  %s1710_s4 = inlined_call_operand.hbm [shape: f32[2,1,256], index: 4, kind: output, shape index: {}]  }
   0x1   :  { %v9_v0 = vstv %s1709_s3 }
   0x2   :  { %10 = vst [vmem:[#allocation2] sm:$0x1] %v9_v0 }
   0x3   :  { %11 = vsyncpa [#allocation4], 0 }
   0x4   :  { %13 = vsyncpa [#allocation4 + $0x1], 0 }
   0x5   :  { %14 = vsyncpa [#allocation7], 0 }
   0x6   :  { %15 = vsyncpa [#allocation5], 0 }
   0x7   :  { %17 = vsyncpa [#allocation5 + $0x1], 0  ;;  %s1413_s17 = smov 0   ;;  %s1415_s18 = smov 0  }
   0x8   :  { %s1417_s19 = smov 0   ;;  %s1419_s20 = smov 0  }
   0x9   :  { %s1421_s21 = smov 0   ;;  %s1423_s22 = smov 0  }
   0xa LB: > { %s1037_s3 = sadd.s32 4294967295, %s1374_s22   ;;  %s1038_s23 = sadd.s32 4294967294, %s1374_s22   ;;  %s1374_s22 = sphi %s1423_s22, %s23_s22   ;;  %s1370_s21 = sphi %s1421_s21, %s1734_s21   ;;  %s1366_s20 = sphi %s1419_s20, %s1733_s20   ;;  %s1362_s19 = sphi %s1417_s19, %s1732_s19   ;;  %s1358_s18 = sphi %s1415_s18, %s1731_s18   ;;  %s1354_s17 = sphi %s1413_s17, %s1730_s17  }
   0xb   : > { %p57_p0 = scmp.ne.s32.totalorder %s1358_s18, %s1354_s17  ;;  %p1447_p1 = scmp.eq.s32.totalorder %s1037_s3, 0 }
   0xc   : > { %p1451_p2 = scmp.eq.s32.totalorder %s1037_s3, 1  ;;  %p152_p3 = scmp.eq.s32.totalorder %s1038_s23, 1 }
   0xd   : > { %s1715_s24 = scalar_select %p1447_p1, 1, 0 }
   0xe   : > { %s1716_s25 = scalar_select %p1451_p2, 1, 0 }
   0xf   : > { %p1457_p4 = por %p1447_p1, %p57_p0  ;;  %p1039_p5 = scmp.ge.s32.totalorder %s1374_s22, 1 }
  0x10   : > { %p1462_p6 = por %p152_p3, %p57_p0  ;;  %p159_p7 = scmp.lt.s32.totalorder %s1374_s22, 3 }
  0x11   : > { %s1717_s26 = scalar_select %p1457_p4, 1, 0 }
  0x12   : > { %s1718_s27 = scalar_select %p1462_p6, 1, 0 }
  0x13   : > { %p1467_p8 = pnand %p1039_p5, %p159_p7  ;;  %s1376_s29 = smov [#allocation6]  }
  0x14   : > { %s171_s30 = sshll.u32 %s1376_s29, 4  ;;  %s35_s6 = sadd.s32 1, %s1370_s21  ;;  %s172_s30 = int_to_ptr.vmem [resolvable:$true] %s171_s30 }
  0x15   : > { %s1719_s28 = scalar_select %p1467_p8, 1, 0 }
  0x16   : > { %p1100_p9 = pneg %p1467_p8  ;;  %s1230_s9 = scalar_lea.hbm %s1707_s1, 4096 }
  0x17   : > { %p1231_p12 = scmp.ne.s32.totalorder %s1707_s1, %s1230_s9  ;;  %p1237_p5 = scmp.lt.u32.totalorder %s1230_s9, %s1707_s1 }
  0x18   : > { %p1476_p11 = pnand %p1100_p9, %p1447_p1 }
  0x1a   : > { %p1232_p13 = pneg %p1476_p11 }
  0x1c   : > { %p1233_p0 = pnand %p1232_p13, %p1231_p12 }
  0x1e   : > { %p1234_p3 = pneg %p1233_p0 }
  0x20   : > { %p1239_p7 = pnand %p1237_p5, %p1234_p3 }
  0x22   : > { %1242 = shalt.err (!%p1239_p7)
}
  0x23   : > { %s1243_s14 = scalar_lea.vmem %s172_s30, 4096  ;;  %p1251_p1 = scmp.lt.s32.totalorder %s172_s30, %s172_s30 }
  0x24   : > { %p1244_p9 = scmp.ne.s32.totalorder %s172_s30, %s1243_s14  ;;  %p1252_p4 = scmp.lt.s32.totalorder %s1243_s14, %s1243_s14 }
  0x26   : > { %p1246_p10 = pnand %p1244_p9, %p1232_p13  ;;  %p1253_p8 = por %p1252_p4, %p1251_p1 }
  0x28   : > { %p1247_p6 = pneg %p1246_p10 }
  0x2a   : > { %p1254_p2 = pnand %p1253_p8, %p1247_p6 }
  0x2c   : > { %1257 = shalt.err (!%p1254_p2)
}
  0x2d   : > { %s1377_s15 = smov 128   ;;  %s1378_s16 = smov 8  }
  0x2e   : > { %1103 = dma.hbm_to_vmem [thread:$0]  (!%p1476_p11), %s1707_s1, 4096, %s172_s30, [#allocation7], %s1377_s15, %s1377_s15, %s1378_s16  }
  0x2f   : > { %p37_p1 = scmp.ge.s32.totalorder %s35_s6, 2  ;;  %s44_s29 = sadd.s32 1, %s1362_s19 }
  0x30   : > { %p51_p2 = scmp.ne.s32.totalorder %s1362_s19, %s1358_s18  ;;  %p52_p4 = scmp.eq.s32.totalorder %s1374_s22, 0 }
  0x31   : > { %s1736_s6 = smov (%p37_p1, %s35_s6), 0  ;;  %p1722_p8 = scmp.ne.s32.totalorder %s1716_s25, 0 }
  0x32   : > { %p1503_p6 = por %p52_p4, %p51_p2  ;;  %s39_s5 = ssub.s32 %s1370_s21, %s1736_s6 }
  0x33   : > { %p1509_p10 = por %p1722_p8, %p51_p2  ;;  %p1113_p12 = scmp.lt.s32.totalorder %s1374_s22, 2 }
  0x34   : > { %p42_p11 = scmp.eq.s32.totalorder %s39_s5, 0  ;;  %s191_s30 = sand.u32 1, %s1362_s19  }
  0x35   : > { %s1042_s9 = sshll.u32 %s191_s30, 9  ;;  %s1090_s11 = sshll.u32 %s1370_s21, 13 }
  0x36   : > { %s1518_s10 = scalar_select %p42_p11, %s1362_s19, %s44_s29  }
  0x37   : > { %s1524_s14 = scalar_lea.hbm %s1706_s0, %s1090_s11  ;;  %s195_s25 = scalar_lea.vmem [#allocation3], %s1042_s9 }
  0x38   : > { %s204_s15 = sshll.u32 %s195_s25, 4  ;;  %p1530_p13 = pnand %p1113_p12, %p1503_p6  ;;  %s1526_s15 = int_to_ptr.vmem [resolvable:$true] %s204_s15 }
  0x39   : > { %s1534_s3 = scalar_lea.sflag [#allocation4], %s191_s30  ;;  %s1258_s23 = scalar_lea.hbm %s1524_s14, 8192 }
  0x3a   : > { %p1259_p0 = scmp.ne.s32.totalorder %s1524_s14, %s1258_s23  ;;  %p1260_p3 = pneg %p1530_p13 }
  0x3b   : > { %s1263_s7 = scalar_lea.hbm %s1706_s0, 16384  ;;  %p1264_p9 = scmp.lt.u32.totalorder %s1524_s14, %s1706_s0 }
  0x3c   : > { %p1261_p5 = pnand %p1260_p3, %p1259_p0  ;;  %p1265_p1 = scmp.lt.u32.totalorder %s1263_s7, %s1258_s23 }
  0x3d   : > { %p1267_p4 = scmp.lt.u32.totalorder %s1258_s23, %s1524_s14 }
  0x3e   : > { %p1262_p7 = pneg %p1261_p5  ;;  %p1266_p2 = por %p1265_p1, %p1264_p9 }
  0x40   : > { %p1268_p6 = por %p1267_p4, %p1266_p2 }
  0x42   : > { %p1269_p8 = pnand %p1268_p6, %p1262_p7 }
  0x44   : > { %1272 = shalt.err (!%p1269_p8)
}
  0x45   : > { %s1273_s30 = scalar_lea.vmem %s1526_s15, 8192  ;;  %s1379_s12 = smov [#allocation3]  }
  0x46   : > { %p1274_p12 = scmp.ne.s32.totalorder %s1526_s15, %s1273_s30  ;;  %s1278_s13 = sshll.u32 %s1379_s12, 4  ;;  %s1279_s13 = int_to_ptr.vmem [resolvable:$false] %s1278_s13 }
  0x47   : > { %s1280_s25 = scalar_lea.vmem %s1279_s13, 16384  ;;  %p1281_p5 = scmp.lt.s32.totalorder %s1526_s15, %s1279_s13 }
  0x48   : > { %p1276_p11 = pnand %p1274_p12, %p1260_p3  ;;  %p1282_p9 = scmp.lt.s32.totalorder %s1280_s25, %s1273_s30 }
  0x4a   : > { %p1277_p0 = pneg %p1276_p11  ;;  %p1283_p1 = por %p1282_p9, %p1281_p5 }
  0x4c   : > { %p1284_p2 = pnand %p1283_p1, %p1277_p0 }
  0x4e   : > { %1287 = shalt.err (!%p1284_p2)
}
  0x4f   : > { %s1380_s23 = smov 256   ;;  %s1381_s29 = smov 16  }
  0x50   : > { %1107 = dma.hbm_to_vmem [thread:$0]  (!%p1530_p13), %s1524_s14, 8192, %s1526_s15, %s1534_s3, %s1380_s23, %s1380_s23, %s1381_s29  }
  0x51   : > { %p1725_p3 = scmp.ne.s32.totalorder %s1719_s28, 0 }
  0x52   : > { %s1565_s5 = sand.u32 (!%p1725_p3), 1, %s1358_s18   ;;  %p1726_p7 = scmp.ne.s32.totalorder (!%p1725_p3), %s1717_s26, 0 }
  0x53   : > { %216 = sbr.rel (%p1725_p3) target bundleno = 765 (0x2fd), region = 36  ;;  %s1046_s7 = sshll.u32 (!%p1725_p3), %s1565_s5, 9 }
  0x54   : > { %s219_s9 = scalar_lea.sflag (!%p1725_p3), [#allocation4], %s1565_s5  ;;  %s1569_s11 = scalar_lea.vmem (!%p1725_p3), [#allocation3], %s1046_s7 }
  0x5a   : > { %1341 = dma.done.wait (%p1726_p7), %s219_s9, 8192  }
  0x5b   : > { %1343 = vsyncadd (%p1726_p7), %s219_s9, 4294959104  ;;  %p1727_p13 = scmp.ne.s32.totalorder %s1715_s24, 0 }
  0x5d   : > { %1345 = dma.done.wait (%p1727_p13), [#allocation7], 4096  }
  0x5e   : > { %1347 = vsyncadd (%p1727_p13), [#allocation7], 4294963200  ;;  %v255_v1 = vld [vmem:[%s1569_s11 + $0x8] sm:$0xff]  ;;  %v257_v2 = vld [vmem:[%s1569_s11 + $0x18] sm:$0xff]  ;;  %s1048_s28 = sshll.u32 %s1565_s5, 1  ;;  %s1091_s14 = sshll.u32 %s1366_s20, 5 }
  0x5f   : > { %v254_v3 = vld [vmem:[%s1569_s11] sm:$0xff]  ;;  %v319_v4 = vpack.c.bf16 %v257_v2, %v255_v1  ;;  %v256_v5 = vld [vmem:[%s1569_s11 + $0x10] sm:$0xff]  ;;  %v259_v6 = vld [vmem:[%s1569_s11 + $0x28] sm:$0xff]  ;;  %s250_s15 = scalar_lea.vmem [#allocation8], %s1048_s28  ;;  %s1657_s12 = scalar_lea.hbm %s1710_s4, %s1091_s14 }
  0x60   : > { %v261_v7 = vld [vmem:[%s1569_s11 + $0x38] sm:$0xff]  ;;  %v318_v8 = vpack.c.bf16 %v256_v5, %v254_v3  ;;  %v258_v10 = vld [vmem:[%s1569_s11 + $0x20] sm:$0xff]  ;;  %v260_v11 = vld [vmem:[%s1569_s11 + $0x30] sm:$0xff]  ;;  %s943_s16 = sshll.u32 %s250_s15, 4  ;;  %s927_s13 = scalar_lea.sflag [#allocation5], %s1565_s5  ;;  %s1659_s16 = int_to_ptr.vmem [resolvable:$true] %s943_s16 }
  0x61   : > { %v321_v9 = vpack.c.bf16 %v261_v7, %v259_v6  ;;  %v263_v12 = vld [vmem:[%s1569_s11 + $0x48] sm:$0xff]  ;;  %542 = vmatprep.subr.bf16.mxu0 %v319_v4  ;;  %v265_v13 = vld [vmem:[%s1569_s11 + $0x58] sm:$0xff]  ;;  %v320_v14 = vpack.c.bf16 %v260_v11, %v258_v10  ;;  %v262_v16 = vld [vmem:[%s1569_s11 + $0x40] sm:$0xff]  ;;  %s1288_s25 = scalar_lea.vmem %s1659_s16, 32  ;;  %s1384_s20 = smov [#allocation8]  }
  0x62   : > { %543 = vmatpush1.bf16.msra.mxu0 %v318_v8  ;;  %v323_v15 = vpack.c.bf16 %v265_v13, %v263_v12  ;;  %v264_v17 = vld [vmem:[%s1569_s11 + $0x50] sm:$0xff]  ;;  %v267_v18 = vld [vmem:[%s1569_s11 + $0x68] sm:$0xff]  ;;  %v269_v19 = vld [vmem:[%s1569_s11 + $0x78] sm:$0xff]  ;;  %p1289_p4 = scmp.ne.s32.totalorder %s1659_s16, %s1288_s25  ;;  %s1292_s23 = sshll.u32 %s1384_s20, 4  ;;  %s1293_s23 = int_to_ptr.vmem [resolvable:$false] %s1292_s23 }
  0x63   : > { %544 = vmatprep.subr.bf16.mxu0 %v321_v9  ;;  %v322_v20 = vpack.c.bf16 %v264_v17, %v262_v16  ;;  %v325_v21 = vpack.c.bf16 %v269_v19, %v267_v18  ;;  %v266_v22 = vld [vmem:[%s1569_s11 + $0x60] sm:$0xff]  ;;  %v268_v23 = vld [vmem:[%s1569_s11 + $0x70] sm:$0xff]  ;;  %v271_v24 = vld [vmem:[%s1569_s11 + $0x88] sm:$0xff]  ;;  %s1294_s29 = scalar_lea.vmem %s1293_s23, 64  ;;  %p1295_p12 = scmp.lt.s32.totalorder %s1659_s16, %s1293_s23 }
  0x64   : > { %v273_v25 = vld [vmem:[%s1569_s11 + $0x98] sm:$0xff]  ;;  %v324_v26 = vpack.c.bf16 %v268_v23, %v266_v22  ;;  %v270_v28 = vld [vmem:[%s1569_s11 + $0x80] sm:$0xff]  ;;  %v272_v29 = vld [vmem:[%s1569_s11 + $0x90] sm:$0xff]  ;;  %p1290_p6 = pnand %p1289_p4, %p1509_p10  ;;  %p1296_p11 = scmp.lt.s32.totalorder %s1294_s29, %s1288_s25 }
  0x65   : > { %v327_v27 = vpack.c.bf16 %v273_v25, %v271_v24  ;;  %v275_v30 = vld [vmem:[%s1569_s11 + $0xa8] sm:$0xff]  ;;  %v277_v31 = vld [vmem:[%s1569_s11 + $0xb8] sm:$0xff]  ;;  %v326_v32 = vpack.c.bf16 %v272_v29, %v270_v28  ;;  %v274_v34 = vld [vmem:[%s1569_s11 + $0xa0] sm:$0xff] }
  0x66   : > { %545 = vmatpush1.bf16.msra.mxu0 %v320_v14  ;;  %v329_v33 = vpack.c.bf16 %v277_v31, %v275_v30  ;;  %v276_v35 = vld [vmem:[%s1569_s11 + $0xb0] sm:$0xff]  ;;  %v279_v36 = vld [vmem:[%s1569_s11 + $0xc8] sm:$0xff]  ;;  %v281_v37 = vld [vmem:[%s1569_s11 + $0xd8] sm:$0xff]  ;;  %p1291_p8 = pneg %p1290_p6  ;;  %p1297_p0 = por %p1296_p11, %p1295_p12 }
  0x67   : > { %546 = vmatprep.subr.bf16.mxu0 %v323_v15  ;;  %v328_v38 = vpack.c.bf16 %v276_v35, %v274_v34  ;;  %v278_v39 = vld [vmem:[%s1569_s11 + $0xc0] sm:$0xff]  ;;  %v280_v40 = vld [vmem:[%s1569_s11 + $0xd0] sm:$0xff]  ;;  %v331_v41 = vpack.c.bf16 %v281_v37, %v279_v36  ;;  %v283_v42 = vld [vmem:[%s1569_s11 + $0xe8] sm:$0xff] }
  0x68   : > { %v285_v43 = vld [vmem:[%s1569_s11 + $0xf8] sm:$0xff]  ;;  %v1174_v44 = vld [vmem:[#allocation6 + $0x4] ss:$8 sps:$4 sm:$0xff]   ;;  %v330_v45 = vpack.c.bf16 %v280_v40, %v278_v39  ;;  %v284_v48 = vld [vmem:[%s1569_s11 + $0xf0] sm:$0xff]  ;;  %p1298_p5 = pnand %p1297_p0, %p1291_p8 }
  0x69   : > { %v282_v46 = vld [vmem:[%s1569_s11 + $0xe0] sm:$0xff]  ;;  %574 = vmatprep.mubr.bf16.mxu0 %v1174_v44  ;;  %v333_v47 = vpack.c.bf16 %v285_v43, %v283_v42  ;;  %v287_v49 = vld [vmem:[%s1569_s11 + $0x108] sm:$0xff]  ;;  %v289_v50 = vld [vmem:[%s1569_s11 + $0x118] sm:$0xff] }
  0x6a   : > { %547 = vmatpush1.bf16.msra.mxu0 %v322_v20  ;;  %v332_v51 = vpack.c.bf16 %v284_v48, %v282_v46  ;;  %v286_v52 = vld [vmem:[%s1569_s11 + $0x100] sm:$0xff]  ;;  %v335_v53 = vpack.c.bf16 %v289_v50, %v287_v49  ;;  %v288_v54 = vld [vmem:[%s1569_s11 + $0x110] sm:$0xff]  ;;  %v291_v55 = vld [vmem:[%s1569_s11 + $0x128] sm:$0xff] }
  0x6b   : > { %548 = vmatprep.subr.bf16.mxu0 %v325_v21  ;;  %v293_v56 = vld [vmem:[%s1569_s11 + $0x138] sm:$0xff]  ;;  %v334_v57 = vpack.c.bf16 %v288_v54, %v286_v52  ;;  %v290_v58 = vld [vmem:[%s1569_s11 + $0x120] sm:$0xff]  ;;  %v292_v60 = vld [vmem:[%s1569_s11 + $0x130] sm:$0xff] }
  0x6c   : > { %v337_v59 = vpack.c.bf16 %v293_v56, %v291_v55  ;;  %v295_v61 = vld [vmem:[%s1569_s11 + $0x148] sm:$0xff]  ;;  %v297_v62 = vld [vmem:[%s1569_s11 + $0x158] sm:$0xff]  ;;  %v336_v63 = vpack.c.bf16 %v292_v60, %v290_v58  ;;  %v294_v0 = vld [vmem:[%s1569_s11 + $0x140] sm:$0xff] }
  0x6d   : > { %v339_v1 = vpack.c.bf16 %v297_v62, %v295_v61  ;;  %v296_v2 = vld [vmem:[%s1569_s11 + $0x150] sm:$0xff]  ;;  %v299_v3 = vld [vmem:[%s1569_s11 + $0x168] sm:$0xff]  ;;  %v301_v4 = vld [vmem:[%s1569_s11 + $0x178] sm:$0xff] }
  0x6e   : > { %549 = vmatpush1.bf16.msra.mxu0 %v324_v26  ;;  %v338_v5 = vpack.c.bf16 %v296_v2, %v294_v0  ;;  %v341_v6 = vpack.c.bf16 %v301_v4, %v299_v3  ;;  %v298_v7 = vld [vmem:[%s1569_s11 + $0x160] sm:$0xff]  ;;  %v300_v8 = vld [vmem:[%s1569_s11 + $0x170] sm:$0xff]  ;;  %v303_v9 = vld [vmem:[%s1569_s11 + $0x188] sm:$0xff] }
  0x6f   : > { %550 = vmatprep.subr.bf16.mxu0 %v327_v27  ;;  %v305_v10 = vld [vmem:[%s1569_s11 + $0x198] sm:$0xff]  ;;  %v340_v11 = vpack.c.bf16 %v300_v8, %v298_v7  ;;  %v302_v13 = vld [vmem:[%s1569_s11 + $0x180] sm:$0xff]  ;;  %v304_v14 = vld [vmem:[%s1569_s11 + $0x190] sm:$0xff] }
  0x70   : > { %v343_v12 = vpack.c.bf16 %v305_v10, %v303_v9  ;;  %v307_v15 = vld [vmem:[%s1569_s11 + $0x1a8] sm:$0xff]  ;;  %v309_v16 = vld [vmem:[%s1569_s11 + $0x1b8] sm:$0xff]  ;;  %v342_v17 = vpack.c.bf16 %v304_v14, %v302_v13  ;;  %v306_v19 = vld [vmem:[%s1569_s11 + $0x1a0] sm:$0xff]  ;;  %v1382_v13 = vmov 0  }
  0x71   : > { %v345_v18 = vpack.c.bf16 %v309_v16, %v307_v15  ;;  %v308_v20 = vld [vmem:[%s1569_s11 + $0x1b0] sm:$0xff]  ;;  %v311_v21 = vld [vmem:[%s1569_s11 + $0x1c8] sm:$0xff]  ;;  %v313_v22 = vld [vmem:[%s1569_s11 + $0x1d8] sm:$0xff]  ;;  %1171 = vset.pattern.permute.xlu0 %v1382_v13 }
  0x72   : > { %551 = vmatpush1.bf16.msra.mxu0 %v326_v32  ;;  %v344_v23 = vpack.c.bf16 %v308_v20, %v306_v19  ;;  %v347_v24 = vpack.c.bf16 %v313_v22, %v311_v21  ;;  %v310_v25 = vld [vmem:[%s1569_s11 + $0x1c0] sm:$0xff]  ;;  %v312_v26 = vld [vmem:[%s1569_s11 + $0x1d0] sm:$0xff]  ;;  %v315_v27 = vld [vmem:[%s1569_s11 + $0x1e8] sm:$0xff] }
  0x73   : > { %552 = vmatprep.subr.bf16.mxu0 %v329_v33  ;;  %v317_v28 = vld [vmem:[%s1569_s11 + $0x1f8] sm:$0xff]  ;;  %v346_v29 = vpack.c.bf16 %v312_v26, %v310_v25  ;;  %v314_v31 = vld [vmem:[%s1569_s11 + $0x1e0] sm:$0xff]  ;;  %v316_v32 = vld [vmem:[%s1569_s11 + $0x1f0] sm:$0xff] }
  0x74   : > { %v349_v30 = vpack.c.bf16 %v317_v28, %v315_v27  ;;  %v348_v33 = vpack.c.bf16 %v316_v32, %v314_v31  ;;  %v1172_v34 = vld [vmem:[#allocation6] ss:$8 sps:$4 sm:$0xff]   ;;  %v1175_v35 = vld [vmem:[#allocation6 + $0x14] ss:$8 sps:$4 sm:$0xff]   ;;  %v1177_v36 = vld [vmem:[#allocation6 + $0x10] ss:$8 sps:$4 sm:$0xff]  }
  0x75   : > { %v1178_v37 = vld [vmem:[#allocation6 + $0x24] ss:$8 sps:$4 sm:$0xff]   ;;  %v1181_v39 = vld [vmem:[#allocation6 + $0x34] ss:$8 sps:$4 sm:$0xff]   ;;  %v1183_v40 = vld [vmem:[#allocation6 + $0x30] ss:$8 sps:$4 sm:$0xff]  }
  0x76   : > { %553 = vmatpush1.bf16.msra.mxu0 %v328_v38  ;;  %v1180_v38 = vld [vmem:[#allocation6 + $0x20] ss:$8 sps:$4 sm:$0xff]   ;;  %v1187_v43 = vld [vmem:[#allocation6 + $0x54] ss:$8 sps:$4 sm:$0xff]   ;;  %v1189_v44 = vld [vmem:[#allocation6 + $0x50] ss:$8 sps:$4 sm:$0xff]  }
  0x77   : > { %554 = vmatprep.subr.bf16.mxu0 %v331_v41  ;;  %v1184_v41 = vld [vmem:[#allocation6 + $0x44] ss:$8 sps:$4 sm:$0xff]   ;;  %v1186_v42 = vld [vmem:[#allocation6 + $0x40] ss:$8 sps:$4 sm:$0xff]   ;;  %v1195_v48 = vld [vmem:[#allocation6 + $0x70] ss:$8 sps:$4 sm:$0xff]  }
  0x78   : > { %v1192_v46 = vld [vmem:[#allocation6 + $0x60] ss:$8 sps:$4 sm:$0xff]   ;;  %v1196_v49 = vld [vmem:[#allocation6 + $0x84] ss:$8 sps:$4 sm:$0xff]   ;;  %v1201_v52 = vld [vmem:[#allocation6 + $0x90] ss:$8 sps:$4 sm:$0xff]  }
  0x79   : > { %v1198_v50 = vld [vmem:[#allocation6 + $0x80] ss:$8 sps:$4 sm:$0xff]   ;;  %v1205_v55 = vld [vmem:[#allocation6 + $0xb4] ss:$8 sps:$4 sm:$0xff]   ;;  %v1207_v56 = vld [vmem:[#allocation6 + $0xb0] ss:$8 sps:$4 sm:$0xff]  }
  0x7a   : > { %555 = vmatpush1.bf16.msra.mxu0 %v330_v45  ;;  %v1190_v45 = vld [vmem:[#allocation6 + $0x64] ss:$8 sps:$4 sm:$0xff]   ;;  %v1204_v54 = vld [vmem:[#allocation6 + $0xa0] ss:$8 sps:$4 sm:$0xff]   ;;  %v1213_v60 = vld [vmem:[#allocation6 + $0xd0] ss:$8 sps:$4 sm:$0xff]  }
  0x7b   : > { %556 = vmatprep.subr.bf16.mxu0 %v333_v47  ;;  %v1193_v47 = vld [vmem:[#allocation6 + $0x74] ss:$8 sps:$4 sm:$0xff]   ;;  %v1210_v58 = vld [vmem:[#allocation6 + $0xc0] ss:$8 sps:$4 sm:$0xff]   ;;  %v1214_v61 = vld [vmem:[#allocation6 + $0xe4] ss:$8 sps:$4 sm:$0xff]  }
  0x7c   : > { %v1216_v62 = vld [vmem:[#allocation6 + $0xe0] ss:$8 sps:$4 sm:$0xff]   ;;  %v1219_v0 = vld [vmem:[#allocation6 + $0xf0] ss:$8 sps:$4 sm:$0xff]  }
  0x7d   : > { %v1646_v2 = vld [vmem:[%s1708_s2] sm:$0xff] }
  0x7e   : > { %557 = vmatpush1.bf16.msra.mxu0 %v332_v51  ;;  %v1199_v51 = vld [vmem:[#allocation6 + $0x94] ss:$8 sps:$4 sm:$0xff]   ;;  %v1082_v4 = vcombine.high %v1646_v2, %v1646_v2 }
  0x7f   : > { %558 = vmatprep.subr.bf16.mxu0 %v335_v53  ;;  %v1202_v53 = vld [vmem:[#allocation6 + $0xa4] ss:$8 sps:$4 sm:$0xff]  }
  0x80   : > { %871 = vmatprep.mubr.bf16.mxu1 %v1082_v4 }
  0x82   : > { %559 = vmatpush1.bf16.msra.mxu0 %v334_v57  ;;  %v1208_v57 = vld [vmem:[#allocation6 + $0xc4] ss:$8 sps:$4 sm:$0xff]  }
  0x83   : > { %560 = vmatprep.subr.bf16.mxu0 %v337_v59  ;;  %v1211_v59 = vld [vmem:[#allocation6 + $0xd4] ss:$8 sps:$4 sm:$0xff]  }
  0x86   : > { %561 = vmatpush1.bf16.msra.mxu0 %v336_v63  ;;  %v1217_v63 = vld [vmem:[#allocation6 + $0xf4] ss:$8 sps:$4 sm:$0xff]  }
  0x87   : > { %562 = vmatprep.subr.bf16.mxu0 %v339_v1 }
  0x8a   : > { %563 = vmatpush1.bf16.msra.mxu0 %v338_v5 }
  0x8b   : > { %564 = vmatprep.subr.bf16.mxu0 %v341_v6 }
  0x8e   : > { %565 = vmatpush1.bf16.msra.mxu0 %v340_v11  ;;  %v253_v11 = vld [vmem:[#allocation2] sm:$0x1] }
  0x8f   : > { %566 = vmatprep.subr.bf16.mxu0 %v343_v12  ;;  %882 = vperm.xlu0 %1171, %v253_v11  }
  0x92   : > { %567 = vmatpush1.bf16.msra.mxu0 %v342_v17 }
  0x93   : > { %568 = vmatprep.subr.bf16.mxu0 %v345_v18 }
  0x96   : > { %569 = vmatpush1.bf16.msra.mxu0 %v344_v23 }
  0x97   : > { %570 = vmatprep.subr.bf16.mxu0 %v347_v24 }
  0x9a   : > { %571 = vmatpush1.bf16.msra.mxu0 %v346_v29 }
  0x9b   : > { %572 = vmatprep.subr.bf16.mxu0 %v349_v30 }
  0x9e   : > { %573 = vmatpush1.bf16.msra.mxu0 %v348_v33 }
  0xa1   : > { %575 = vmatmul.mubr.bf16.vlgmr.msra.gmra.mrb[0].mxu0 %v1172_v34 }
  0xa2   : > { %584 = vmatprep.mubr.bf16.mxu0 %v1175_v35 }
  0xa9   : > { %585 = vmatmul.mubr.bf16.gmra.mrb[4].mxu0 %v1177_v36 }
  0xaa   : > { %594 = vmatprep.mubr.bf16.mxu0 %v1178_v37 }
  0xb1   : > { %595 = vmatmul.mubr.bf16.gmra.mrb[8].mxu0 %v1180_v38 }
  0xb2   : > { %604 = vmatprep.mubr.bf16.mxu0 %v1181_v39 }
  0xb9   : > { %605 = vmatmul.mubr.bf16.gmra.mrb[12].mxu0 %v1183_v40 }
  0xba   : > { %614 = vmatprep.mubr.bf16.mxu0 %v1184_v41 }
  0xc1   : > { %615 = vmatmul.mubr.bf16.gmra.mrb[16].mxu0 %v1186_v42 }
  0xc2   : > { %624 = vmatprep.mubr.bf16.mxu0 %v1187_v43 }
  0xc9   : > { %625 = vmatmul.mubr.bf16.gmra.mrb[20].mxu0 %v1189_v44 }
  0xca   : > { %634 = vmatprep.mubr.bf16.mxu0 %v1190_v45 }
  0xd1   : > { %635 = vmatmul.mubr.bf16.gmra.mrb[24].mxu0 %v1192_v46 }
  0xd2   : > { %644 = vmatprep.mubr.bf16.mxu0 %v1193_v47 }
  0xd9   : > { %645 = vmatmul.mubr.bf16.gmra.mrb[28].mxu0 %v1195_v48 }
  0xda   : > { %654 = vmatprep.mubr.bf16.mxu0 %v1196_v49 }
  0xe1   : > { %655 = vmatmul.mubr.bf16.gmra.mrb[32].mxu0 %v1198_v50 }
  0xe2   : > { %664 = vmatprep.mubr.bf16.mxu0 %v1199_v51 }
  0xe9   : > { %665 = vmatmul.mubr.bf16.gmra.mrb[36].mxu0 %v1201_v52 }
  0xea   : > { %674 = vmatprep.mubr.bf16.mxu0 %v1202_v53 }
  0xf1   : > { %675 = vmatmul.mubr.bf16.gmra.mrb[40].mxu0 %v1204_v54 }
  0xf2   : > { %684 = vmatprep.mubr.bf16.mxu0 %v1205_v55 }
  0xf9   : > { %685 = vmatmul.mubr.bf16.gmra.mrb[44].mxu0 %v1207_v56 }
  0xfa   : > { %694 = vmatprep.mubr.bf16.mxu0 %v1208_v57 }
 0x101   : > { %695 = vmatmul.mubr.bf16.gmra.mrb[48].mxu0 %v1210_v58 }
 0x102   : > { %704 = vmatprep.mubr.bf16.mxu0 %v1211_v59 }
 0x109   : > { %705 = vmatmul.mubr.bf16.gmra.mrb[52].mxu0 %v1213_v60 }
 0x10a   : > { %714 = vmatprep.mubr.bf16.mxu0 %v1214_v61 }
 0x111   : > { %715 = vmatmul.mubr.bf16.gmra.mrb[56].mxu0 %v1216_v62 }
 0x112   : > { %724 = vmatprep.mubr.bf16.mxu0 %v1217_v63 }
 0x119   : > { %725 = vmatmul.mubr.bf16.gmra.mrb[60].mxu0 %v1219_v0 }
 0x174   : > { %v576_v1 = vpop.f32.mrb[0].mxu0 }
 0x175   : > { %v578_v3 = vpop.f32.mrb[1].mxu0  ;;  %v735_v6 = vmax.f32 %v576_v1, 0.0 }
 0x176   : > { %v580_v5 = vpop.f32.mrb[2].mxu0  ;;  %v736_v9 = vmax.f32 %v578_v3, 0.0 }
 0x177   : > { %v737_v7 = vmax.f32 %v580_v5, 0.0  ;;  %v582_v8 = vpop.f32.mrb[3].mxu0 }
 0x178   : > { %v738_v10 = vmax.f32 %v582_v8, 0.0 }
 0x179   : > { %v799_v12 = vpack.c.bf16 %v737_v7, %v735_v6 }
 0x17a   : > { %v800_v14 = vpack.c.bf16 %v738_v10, %v736_v9 }
 0x17c   : > { %v586_v15 = vpop.f32.mrb[4].mxu0  ;;  %839 = vmatprep.subr.bf16.mxu1 %v800_v14 }
 0x17d   : > { %v588_v16 = vpop.f32.mrb[5].mxu0  ;;  %840 = vmatpush1.bf16.msra.mxu1 %v799_v12  ;;  %v739_v18 = vmax.f32 %v586_v15, 0.0 }
 0x17e   : > { %v590_v17 = vpop.f32.mrb[6].mxu0  ;;  %v740_v21 = vmax.f32 %v588_v16, 0.0 }
 0x17f   : > { %v741_v19 = vmax.f32 %v590_v17, 0.0  ;;  %v592_v20 = vpop.f32.mrb[7].mxu0 }
 0x180   : > { %v742_v22 = vmax.f32 %v592_v20, 0.0 }
 0x181   : > { %v801_v23 = vpack.c.bf16 %v741_v19, %v739_v18 }
 0x182   : > { %v802_v24 = vpack.c.bf16 %v742_v22, %v740_v21 }
 0x184   : > { %v596_v25 = vpop.f32.mrb[8].mxu0  ;;  %841 = vmatprep.subr.bf16.mxu1 %v802_v24 }
 0x185   : > { %v598_v26 = vpop.f32.mrb[9].mxu0  ;;  %842 = vmatpush1.bf16.msra.mxu1 %v801_v23  ;;  %v743_v28 = vmax.f32 %v596_v25, 0.0 }
 0x186   : > { %v600_v27 = vpop.f32.mrb[10].mxu0  ;;  %v744_v31 = vmax.f32 %v598_v26, 0.0 }
 0x187   : > { %v745_v29 = vmax.f32 %v600_v27, 0.0  ;;  %v602_v30 = vpop.f32.mrb[11].mxu0 }
 0x188   : > { %v746_v32 = vmax.f32 %v602_v30, 0.0 }
 0x189   : > { %v803_v33 = vpack.c.bf16 %v745_v29, %v743_v28 }
 0x18a   : > { %v804_v34 = vpack.c.bf16 %v746_v32, %v744_v31 }
 0x18c   : > { %v606_v35 = vpop.f32.mrb[12].mxu0  ;;  %843 = vmatprep.subr.bf16.mxu1 %v804_v34 }
 0x18d   : > { %v608_v36 = vpop.f32.mrb[13].mxu0  ;;  %844 = vmatpush1.bf16.msra.mxu1 %v803_v33  ;;  %v747_v38 = vmax.f32 %v606_v35, 0.0 }
 0x18e   : > { %v610_v37 = vpop.f32.mrb[14].mxu0  ;;  %v748_v41 = vmax.f32 %v608_v36, 0.0 }
 0x18f   : > { %v749_v39 = vmax.f32 %v610_v37, 0.0  ;;  %v612_v40 = vpop.f32.mrb[15].mxu0 }
 0x190   : > { %v750_v42 = vmax.f32 %v612_v40, 0.0 }
 0x191   : > { %v805_v43 = vpack.c.bf16 %v749_v39, %v747_v38 }
 0x192   : > { %v806_v44 = vpack.c.bf16 %v750_v42, %v748_v41 }
 0x194   : > { %v616_v45 = vpop.f32.mrb[16].mxu0  ;;  %845 = vmatprep.subr.bf16.mxu1 %v806_v44 }
 0x195   : > { %v618_v46 = vpop.f32.mrb[17].mxu0  ;;  %846 = vmatpush1.bf16.msra.mxu1 %v805_v43  ;;  %v751_v48 = vmax.f32 %v616_v45, 0.0 }
 0x196   : > { %v620_v47 = vpop.f32.mrb[18].mxu0  ;;  %v752_v51 = vmax.f32 %v618_v46, 0.0 }
 0x197   : > { %v753_v49 = vmax.f32 %v620_v47, 0.0  ;;  %v622_v50 = vpop.f32.mrb[19].mxu0 }
 0x198   : > { %v754_v52 = vmax.f32 %v622_v50, 0.0 }
 0x199   : > { %v807_v53 = vpack.c.bf16 %v753_v49, %v751_v48 }
 0x19a   : > { %v808_v54 = vpack.c.bf16 %v754_v52, %v752_v51 }
 0x19c   : > { %v626_v55 = vpop.f32.mrb[20].mxu0  ;;  %847 = vmatprep.subr.bf16.mxu1 %v808_v54 }
 0x19d   : > { %v628_v56 = vpop.f32.mrb[21].mxu0  ;;  %848 = vmatpush1.bf16.msra.mxu1 %v807_v53  ;;  %v755_v58 = vmax.f32 %v626_v55, 0.0 }
 0x19e   : > { %v630_v57 = vpop.f32.mrb[22].mxu0  ;;  %v756_v61 = vmax.f32 %v628_v56, 0.0 }
 0x19f   : > { %v757_v59 = vmax.f32 %v630_v57, 0.0  ;;  %v632_v60 = vpop.f32.mrb[23].mxu0 }
 0x1a0   : > { %v758_v62 = vmax.f32 %v632_v60, 0.0 }
 0x1a1   : > { %v809_v63 = vpack.c.bf16 %v757_v59, %v755_v58 }
 0x1a2   : > { %v810_v0 = vpack.c.bf16 %v758_v62, %v756_v61 }
 0x1a4   : > { %v636_v1 = vpop.f32.mrb[24].mxu0  ;;  %849 = vmatprep.subr.bf16.mxu1 %v810_v0 }
 0x1a5   : > { %v638_v3 = vpop.f32.mrb[25].mxu0  ;;  %850 = vmatpush1.bf16.msra.mxu1 %v809_v63  ;;  %v759_v5 = vmax.f32 %v636_v1, 0.0 }
 0x1a6   : > { %v640_v4 = vpop.f32.mrb[26].mxu0  ;;  %v760_v8 = vmax.f32 %v638_v3, 0.0 }
 0x1a7   : > { %v761_v6 = vmax.f32 %v640_v4, 0.0  ;;  %v642_v7 = vpop.f32.mrb[27].mxu0 }
 0x1a8   : > { %v762_v9 = vmax.f32 %v642_v7, 0.0 }
 0x1a9   : > { %v811_v10 = vpack.c.bf16 %v761_v6, %v759_v5 }
 0x1aa   : > { %v812_v11 = vpack.c.bf16 %v762_v9, %v760_v8 }
 0x1ac   : > { %v646_v12 = vpop.f32.mrb[28].mxu0  ;;  %851 = vmatprep.subr.bf16.mxu1 %v812_v11 }
 0x1ad   : > { %v648_v13 = vpop.f32.mrb[29].mxu0  ;;  %852 = vmatpush1.bf16.msra.mxu1 %v811_v10  ;;  %v763_v15 = vmax.f32 %v646_v12, 0.0 }
 0x1ae   : > { %v650_v14 = vpop.f32.mrb[30].mxu0  ;;  %v764_v18 = vmax.f32 %v648_v13, 0.0 }
 0x1af   : > { %v765_v16 = vmax.f32 %v650_v14, 0.0  ;;  %v652_v17 = vpop.f32.mrb[31].mxu0 }
 0x1b0   : > { %v766_v19 = vmax.f32 %v652_v17, 0.0 }
 0x1b1   : > { %v813_v20 = vpack.c.bf16 %v765_v16, %v763_v15 }
 0x1b2   : > { %v814_v21 = vpack.c.bf16 %v766_v19, %v764_v18 }
 0x1b4   : > { %v656_v22 = vpop.f32.mrb[32].mxu0  ;;  %853 = vmatprep.subr.bf16.mxu1 %v814_v21 }
 0x1b5   : > { %v658_v23 = vpop.f32.mrb[33].mxu0  ;;  %854 = vmatpush1.bf16.msra.mxu1 %v813_v20  ;;  %v767_v25 = vmax.f32 %v656_v22, 0.0 }
 0x1b6   : > { %v660_v24 = vpop.f32.mrb[34].mxu0  ;;  %v768_v28 = vmax.f32 %v658_v23, 0.0 }
 0x1b7   : > { %v769_v26 = vmax.f32 %v660_v24, 0.0  ;;  %v662_v27 = vpop.f32.mrb[35].mxu0 }
 0x1b8   : > { %v770_v29 = vmax.f32 %v662_v27, 0.0 }
 0x1b9   : > { %v815_v30 = vpack.c.bf16 %v769_v26, %v767_v25 }
 0x1ba   : > { %v816_v31 = vpack.c.bf16 %v770_v29, %v768_v28 }
 0x1bc   : > { %v666_v32 = vpop.f32.mrb[36].mxu0  ;;  %855 = vmatprep.subr.bf16.mxu1 %v816_v31 }
 0x1bd   : > { %v668_v33 = vpop.f32.mrb[37].mxu0  ;;  %856 = vmatpush1.bf16.msra.mxu1 %v815_v30  ;;  %v771_v35 = vmax.f32 %v666_v32, 0.0 }
 0x1be   : > { %v670_v34 = vpop.f32.mrb[38].mxu0  ;;  %v772_v38 = vmax.f32 %v668_v33, 0.0 }
 0x1bf   : > { %v773_v36 = vmax.f32 %v670_v34, 0.0  ;;  %v672_v37 = vpop.f32.mrb[39].mxu0 }
 0x1c0   : > { %v774_v39 = vmax.f32 %v672_v37, 0.0 }
 0x1c1   : > { %v817_v40 = vpack.c.bf16 %v773_v36, %v771_v35 }
 0x1c2   : > { %v818_v41 = vpack.c.bf16 %v774_v39, %v772_v38  ;;  %v1081_v39 = vcombine.low %v1646_v2, %v1646_v2 }
 0x1c4   : > { %v676_v42 = vpop.f32.mrb[40].mxu0  ;;  %857 = vmatprep.subr.bf16.mxu1 %v818_v41 }
 0x1c5   : > { %v678_v43 = vpop.f32.mrb[41].mxu0  ;;  %858 = vmatpush1.bf16.msra.mxu1 %v817_v40  ;;  %v775_v45 = vmax.f32 %v676_v42, 0.0  ;;  %v885_v40 = vlaneseq }
 0x1c6   : > { %v680_v44 = vpop.f32.mrb[42].mxu0  ;;  %v776_v48 = vmax.f32 %v678_v43, 0.0  ;;  %v883_v43 = vpop.permute.xlu0 %882 }
 0x1c7   : > { %v777_v46 = vmax.f32 %v680_v44, 0.0  ;;  %v682_v47 = vpop.f32.mrb[43].mxu0  ;;  %v886_v41 = vshrl.u32 %v885_v40, 7  ;;  %vm923_vm0 = vcmp.lt.s32.totalorder %v885_v40, 256 }
 0x1c8   : > { %v778_v49 = vmax.f32 %v682_v47, 0.0 }
 0x1c9   : > { %v819_v50 = vpack.c.bf16 %v777_v46, %v775_v45  ;;  %v887_v42 = vsub.s32 0, %v886_v41 }
 0x1ca   : > { %v820_v51 = vpack.c.bf16 %v778_v49, %v776_v48 }
 0x1cb   : > { %v888_v44 = vrot.slane %v883_v43, %v887_v42 }
 0x1cc   : > { %v686_v52 = vpop.f32.mrb[44].mxu0  ;;  %859 = vmatprep.subr.bf16.mxu1 %v820_v51 }
 0x1cd   : > { %v688_v53 = vpop.f32.mrb[45].mxu0  ;;  %860 = vmatpush1.bf16.msra.mxu1 %v819_v50  ;;  %v779_v55 = vmax.f32 %v686_v52, 0.0 }
 0x1ce   : > { %v690_v54 = vpop.f32.mrb[46].mxu0  ;;  %v780_v58 = vmax.f32 %v688_v53, 0.0 }
 0x1cf   : > { %v781_v56 = vmax.f32 %v690_v54, 0.0  ;;  %v692_v57 = vpop.f32.mrb[47].mxu0 }
 0x1d0   : > { %v782_v59 = vmax.f32 %v692_v57, 0.0 }
 0x1d1   : > { %v821_v60 = vpack.c.bf16 %v781_v56, %v779_v55  ;;  %v1383_v56 = vmov 1966171168  }
 0x1d2   : > { %v822_v61 = vpack.c.bf16 %v782_v59, %v780_v58  ;;  %v907_v57 = vunpack.c.l.s4 %v1383_v56 }
 0x1d4   : > { %v696_v62 = vpop.f32.mrb[48].mxu0  ;;  %861 = vmatprep.subr.bf16.mxu1 %v822_v61  ;;  %v908_v58 = vunpack.c.0.s8 %v907_v57 }
 0x1d5   : > { %v698_v63 = vpop.f32.mrb[49].mxu0  ;;  %862 = vmatpush1.bf16.msra.mxu1 %v821_v60  ;;  %v783_v1 = vmax.f32 %v696_v62, 0.0 }
 0x1d6   : > { %v700_v0 = vpop.f32.mrb[50].mxu0  ;;  %v784_v5 = vmax.f32 %v698_v63, 0.0  ;;  %v911_v60 = vsub.s32 %v908_v58, %v886_v41 }
 0x1d7   : > { %v785_v3 = vmax.f32 %v700_v0, 0.0  ;;  %v702_v4 = vpop.f32.mrb[51].mxu0 }
 0x1d8   : > { %v786_v6 = vmax.f32 %v702_v4, 0.0 }
 0x1d9   : > { %v823_v7 = vpack.c.bf16 %v785_v3, %v783_v1 }
 0x1da   : > { %v824_v8 = vpack.c.bf16 %v786_v6, %v784_v5 }
 0x1dc   : > { %v706_v9 = vpop.f32.mrb[52].mxu0  ;;  %863 = vmatprep.subr.bf16.mxu1 %v824_v8 }
 0x1dd   : > { %v708_v10 = vpop.f32.mrb[53].mxu0  ;;  %864 = vmatpush1.bf16.msra.mxu1 %v823_v7  ;;  %v787_v12 = vmax.f32 %v706_v9, 0.0 }
 0x1de   : > { %v710_v11 = vpop.f32.mrb[54].mxu0  ;;  %v788_v15 = vmax.f32 %v708_v10, 0.0 }
 0x1df   : > { %v789_v13 = vmax.f32 %v710_v11, 0.0  ;;  %v712_v14 = vpop.f32.mrb[55].mxu0 }
 0x1e0   : > { %v790_v16 = vmax.f32 %v712_v14, 0.0 }
 0x1e1   : > { %v825_v17 = vpack.c.bf16 %v789_v13, %v787_v12 }
 0x1e2   : > { %v826_v18 = vpack.c.bf16 %v790_v16, %v788_v15 }
 0x1e4   : > { %v716_v19 = vpop.f32.mrb[56].mxu0  ;;  %865 = vmatprep.subr.bf16.mxu1 %v826_v18 }
 0x1e5   : > { %v718_v20 = vpop.f32.mrb[57].mxu0  ;;  %866 = vmatpush1.bf16.msra.mxu1 %v825_v17  ;;  %v791_v22 = vmax.f32 %v716_v19, 0.0 }
 0x1e6   : > { %v720_v21 = vpop.f32.mrb[58].mxu0  ;;  %v792_v25 = vmax.f32 %v718_v20, 0.0 }
 0x1e7   : > { %v793_v23 = vmax.f32 %v720_v21, 0.0  ;;  %v722_v24 = vpop.f32.mrb[59].mxu0 }
 0x1e8   : > { %v794_v26 = vmax.f32 %v722_v24, 0.0 }
 0x1e9   : > { %v827_v27 = vpack.c.bf16 %v793_v23, %v791_v22 }
 0x1ea   : > { %v828_v28 = vpack.c.bf16 %v794_v26, %v792_v25 }
 0x1ec   : > { %v726_v29 = vpop.f32.mrb[60].mxu0  ;;  %867 = vmatprep.subr.bf16.mxu1 %v828_v28 }
 0x1ed   : > { %v728_v30 = vpop.f32.mrb[61].mxu0  ;;  %868 = vmatpush1.bf16.msra.mxu1 %v827_v27  ;;  %v795_v32 = vmax.f32 %v726_v29, 0.0 }
 0x1ee   : > { %v730_v31 = vpop.f32.mrb[62].mxu0  ;;  %v796_v35 = vmax.f32 %v728_v30, 0.0 }
 0x1ef   : > { %v797_v33 = vmax.f32 %v730_v31, 0.0  ;;  %v732_v34 = vpop.f32.mrb[63].mxu0 }
 0x1f0   : > { %v798_v36 = vmax.f32 %v732_v34, 0.0 }
 0x1f1   : > { %v829_v37 = vpack.c.bf16 %v797_v33, %v795_v32 }
 0x1f2   : > { %v830_v38 = vpack.c.bf16 %v798_v36, %v796_v35 }
 0x1f4   : > { %869 = vmatprep.subr.bf16.mxu1 %v830_v38 }
 0x1f5   : > { %870 = vmatpush1.bf16.msra.mxu1 %v829_v37 }
 0x1f8   : > { %872 = vmatmul.mubr.bf16.vlgmr.msra.gmra.mrb[0].mxu1 %v1081_v39 }
 0x2cb   : > { %v873_v45 = vpop.f32.mrb[0].mxu1 }
 0x2cc   : > { %v889_v46 = vadd.f32 %v888_v44, %v873_v45  ;;  %v875_v47 = vpop.f32.mrb[1].mxu1 }
 0x2cd   : > { %v890_v48 = vadd.f32 %v888_v44, %v875_v47  ;;  %v877_v49 = vpop.f32.mrb[2].mxu1 }
 0x2ce   : > { %v1083_v50 = vmul.f32 -1.442695, %v889_v46  ;;  %v878_v51 = vpop.f32.mrb[3].mxu1 }
 0x2cf   : > { %v1084_v52 = vmul.f32 -1.442695, %v890_v48 }
 0x2d0   : > { %1222 = vpow2.f32 %v1083_v50 }
 0x2d1   : > { %1224 = vpow2.f32 %v1084_v52 }
 0x2da   : > { %v1223_v2 = vpop.eup %1222 }
 0x2db   : > { %v1225_v53 = vpop.eup %1224  ;;  %v897_v54 = vadd.f32 1.0, %v1223_v2 }
 0x2dc   : > { %v898_v55 = vadd.f32 1.0, %v1225_v53 }
 0x2dd   : > { %1226 = vrcp.f32 %v897_v54 }
 0x2de   : > { %1228 = vrcp.f32 %v898_v55 }
 0x2e7   : > { %v1227_v59 = vpop.eup %1226 }
 0x2e8   : > { %v1229_v61 = vpop.eup %1228 }
 0x2e9   : > { %v905_v62 = vcombine.low %v1227_v59, %v1229_v61 }
 0x2eb   : > { %v912_v63 = vrot.slane %v905_v62, %v911_v60 }
 0x2ed   : > { %v919_v0 = vrot.slane %v912_v63, %v911_v60 }
 0x2ef   : > { %925 = vst.msk [vmem:[%s250_s15] sm:$0x3] %vm923_vm0, %v919_v0 }
 0x2f0   : > { %1301 = shalt.err (!%p1298_p5)
}
 0x2f1   : > { %s1302_s5 = scalar_lea.hbm %s1657_s12, 32  ;;  %s1306_s11 = scalar_lea.hbm %s1710_s4, 64 }
 0x2f2   : > { %p1303_p9 = scmp.ne.s32.totalorder %s1657_s12, %s1302_s5  ;;  %p1307_p3 = scmp.lt.u32.totalorder %s1657_s12, %s1710_s4 }
 0x2f3   : > { %p1308_p7 = scmp.lt.u32.totalorder %s1306_s11, %s1302_s5  ;;  %p1310_p4 = scmp.lt.u32.totalorder %s1302_s5, %s1657_s12 }
 0x2f4   : > { %p1304_p1 = pnand %p1303_p9, %p1509_p10 }
 0x2f5   : > { %p1309_p13 = por %p1308_p7, %p1307_p3 }
 0x2f6   : > { %p1305_p2 = pneg %p1304_p1 }
 0x2f7   : > { %p1311_p6 = por %p1310_p4, %p1309_p13 }
 0x2f9   : > { %p1312_p8 = pnand %p1311_p6, %p1305_p2 }
 0x2fb   : > { %1315 = shalt.err (!%p1312_p8)
}
 0x2fc   : > { %1098 = dma.vmem_to_hbm [thread:$0]  (%p1509_p10), %s1659_s16, 32, %s1657_s12, %s927_s13  }
 0x2fd PF: > { %s955_s28 = sand.u32 1, %s1354_s17   ;;  %p1728_p12 = scmp.ne.s32.totalorder %s1718_s27, 0 }
 0x2fe   : > { %p1729_p11 = scmp.ge.s32.totalorder %s1374_s22, 2  ;;  %s956_s14 = scalar_lea.sflag [#allocation5], %s955_s28 }
 0x300   : > { %p1109_p0 = pnand %p1729_p11, %p1728_p12 }
 0x302   : > { %1349 = dma.done.wait (!%p1109_p0), %s956_s14, 32  }
 0x303   : > { %1351 = vsyncadd (!%p1109_p0), %s956_s14, 4294967264  ;;  %s23_s22 = sadd.s32 1, %s1374_s22   ;;  %s1730_s17 = smov %s1358_s18 }
 0x304   : > { %p20_p5 = scmp.ge.s32.totalorder %s23_s22, 4   ;;  %s1731_s18 = smov %s1362_s19 }
 0x305   : > { %s1732_s19 = smov %s1518_s10  ;;  %s1733_s20 = smov %s1370_s21 }
 0x306   : > { %s1734_s21 = smov %s1736_s6  ;;  %22 = sbr.rel (!%p20_p5) target bundleno = 10 (0xa), region = 85 }
 0x30d   :  { %961 = vsyncpa [#allocation4], 1 }
 0x30e   :  { %963 = vsyncpa [#allocation4 + $0x1], 1 }
 0x30f   :  { %964 = vsyncpa [#allocation7], 1 }
 0x310   :  { %965 = vsyncpa [#allocation5], 1 }
 0x311   :  { %967 = vsyncpa [#allocation5 + $0x1], 1 }

</bundles_post_ra>
